<compile_context>
chip_gen: v5e
topology: v5e:2x2
jax: 0.10.0
libtpu: 0.0.40
codegen_flags: <defaults>
</compile_context>

<pallas_src>
import math

import jax
import jax.numpy as jnp
from jax.experimental import pallas as pl
from jax.experimental.pallas import tpu as pltpu


def _round_up(v, m):
    return ((v + m - 1) // m) * m


def sample_power_exponent(key, num_features, shared_exp_strength=0.5):
    """Matches PowerActivation's per-forward random exponent construction.

    Note: the per-feature term is multiplied by the SAME shared sample, as in
    the torch source: (shared*s + shared*randn(F)*(1-s)) * 2 + 0.5.
    """
    k1, k2 = jax.random.split(key)
    shared = jax.random.normal(k1, (1,), dtype=jnp.float32)
    per_feat = jax.random.normal(k2, (num_features,), dtype=jnp.float32)
    return (shared * shared_exp_strength
            + shared * per_feat * (1.0 - shared_exp_strength)) * 2.0 + 0.5


def _power_activation_kernel(x_ref, exp_ref, o_ref):
    # x_ref: (tile_m, tile_n); exp_ref: (1, tile_n), broadcast over sublanes.
    x = x_ref[...].astype(jnp.float32)
    e = exp_ref[...].astype(jnp.float32)
    # Numerically stable softplus; exp/log1p/log/exp run on the EUP slot.
    sp = jnp.maximum(x, 0.0) + jnp.log1p(jnp.exp(-jnp.abs(x)))
    base = sp + jnp.float32(0.001)            # always > 0, so pow == exp(e*log)
    # NOTE: the exponent can be negative; base ~ 1e-3 then gives very large
    # finite f32 results, matching the torch semantics.
    # TODO(synk): on v7x (EUP-bound) a VPU minimax poly for log1p(exp(-|x|))
    # would cut the 4 transcendentals/elem to ~2; kept exact here.
    o_ref[...] = jnp.exp(e * jnp.log(base)).astype(o_ref.dtype)


def power_activation(x, exp, *, tile_m=2048, tile_n=512):
    """x: (..., features); exp: (features,). Returns same shape/dtype as x."""
    orig_shape = x.shape
    F = int(orig_shape[-1])
    M = int(math.prod(orig_shape[:-1])) if len(orig_shape) > 1 else 1
    itemsize = jnp.dtype(x.dtype).itemsize
    sub = max(8, 32 // itemsize)        # sublane granule: 8 f32 / 16 bf16 / 32 int8

    # ---- lane folding: keep blocks lane-dense without any host-side pad ----
    # If F is not a multiple of 128, fold k rows into the lane dimension
    # (reshape is free; only the tiny exponent row gets jnp.tile'd).
    k = 1
    if F % 128 != 0:
        k_needed = 128 // math.gcd(F, 128)   # smallest k with (k*F) % 128 == 0
        if k_needed > 1 and M % k_needed == 0:
            k = k_needed
    Mf, Ff = M // k, F * k

    x2 = x.reshape(Mf, Ff)                               # view-level reshape
    exp_row = exp.reshape(1, F).astype(jnp.float32)
    if k > 1:
        exp_row = jnp.tile(exp_row, (1, k))              # (1, Ff), tiny

    # ---- tile selection (mem-bound elementwise: wide lane-dense blocks) ----
    if Ff <= 8192 or Ff % 128 != 0:
        tile_n = Ff        # full-row slab: sequential DMAs, exp VMEM-resident
    else:
        tile_n = min(_round_up(tile_n, 128), Ff)

    if Mf <= sub:
        tile_m = Mf                       # block == full array dim (allowed)
    else:
        tile_m = max(sub, min(_round_up(tile_m, sub), _round_up(Mf, sub)))
        # Megacore balance (v7x has 2 TCs): keep >= 4 row-tiles when rows allow.
        if Mf > 4 * sub and pl.cdiv(Mf, tile_m) < 4:
            tile_m = max(sub, _round_up(pl.cdiv(Mf, 4), sub))

    # Respect per-TC VMEM (64 MiB v7x, 128 MiB v5e/v6e): shrink the sublane
    # tile until double-buffered in/out blocks plus the in-kernel f32 working
    # copy fit with headroom for pipelining.
    try:
        vmem_cap = int(pltpu.get_tpu_info().vmem_capacity_bytes)
    except Exception:
        vmem_cap = 64 << 20               # conservative fallback (v7x per-TC)
    budget = (vmem_cap * 3) // 4
    while tile_m > sub and 6 * tile_m * tile_n * 4 > budget:
        tile_m = max(sub, _round_up(tile_m // 2, sub))
    footprint = 6 * tile_m * tile_n * 4
    vmem_limit = int(min(max(footprint + (8 << 20), 32 << 20), vmem_cap))

    # cdiv grid: Pallas masks the ragged last block (no host pad / no slice).
    grid = (pl.cdiv(Mf, tile_m), pl.cdiv(Ff, tile_n))

    numel = M * F
    cost = pl.CostEstimate(
        flops=8 * numel,
        transcendentals=4 * numel,                      # exp, log1p, log, exp
        bytes_accessed=2 * numel * itemsize + Ff * 4,   # x in + out + exp row
    )

    out = pl.pallas_call(
        _power_activation_kernel,
        out_shape=jax.ShapeDtypeStruct((Mf, Ff), x.dtype),
        grid_spec=pl.GridSpec(
            grid=grid,
            in_specs=[
                pl.BlockSpec((tile_m, tile_n), lambda i, j: (i, j)),
                pl.BlockSpec((1, tile_n), lambda i, j: (0, j)),
            ],
            out_specs=pl.BlockSpec((tile_m, tile_n), lambda i, j: (i, j)),
        ),
        compiler_params=pltpu.CompilerParams(
            dimension_semantics=("parallel", "parallel"),
            vmem_limit_bytes=vmem_limit,
        ),
        cost_estimate=cost,
    )(x2, exp_row)

    return out.reshape(orig_shape)


def _reference(x, exp):
    sp = jax.nn.softplus(x.astype(jnp.float32))
    return jnp.power(sp + 0.001, exp.astype(jnp.float32)).astype(x.dtype)


if __name__ == "__main__":
    key = jax.random.PRNGKey(0)
    kx, kexp = jax.random.split(key)

    # PFN layout (seq, batch, features); exponent broadcasts over features.
    seq, batch, features = 8, 2, 32
    x = jax.random.normal(kx, (seq, batch, features), dtype=jnp.float32)
    exp = sample_power_exponent(kexp, features)

    y = jax.block_until_ready(power_activation(x, exp))
    y_ref = _reference(x, exp)

    assert y.shape == x.shape and y.dtype == x.dtype
    assert jnp.allclose(y, y_ref, atol=1e-5, rtol=5e-4), (
        float(jnp.max(jnp.abs(y - y_ref))))

    print("KERNEL_OK")
</pallas_src>

<mosaic_0001>
module attributes {stable_mosaic.version = 11 : i64} {
  func.func @_power_activation_kernel(%arg0: i32, %arg1: i32, %arg2: memref<4x128xf32, #tpu.memory_space<vmem>>, %arg3: memref<1x128xf32, #tpu.memory_space<vmem>>, %arg4: memref<4x128xf32, #tpu.memory_space<vmem>>) attributes {dimension_semantics = [#tpu.dimension_semantics<parallel>, #tpu.dimension_semantics<parallel>], iteration_bounds = array<i64: 1, 1>, scalar_prefetch = 0 : i64, scratch_operands = 0 : i64, tpu.core_type = #tpu.core_type<tc>, window_params = [{transform_indices = @transform_0, window_bounds = array<i64: 4, 128>}, {transform_indices = @transform_1, window_bounds = array<i64: 1, 128>}, {transform_indices = @transform_2, window_bounds = array<i64: 4, 128>}]} {
    %c0 = arith.constant 0 : index
    %c0_0 = arith.constant 0 : index
    %0 = vector.load %arg2[%c0, %c0_0] : memref<4x128xf32, #tpu.memory_space<vmem>>, vector<4x128xf32>
    %c0_1 = arith.constant 0 : index
    %c0_2 = arith.constant 0 : index
    %1 = vector.load %arg3[%c0_1, %c0_2] : memref<1x128xf32, #tpu.memory_space<vmem>>, vector<1x128xf32>
    %cst = arith.constant 0.000000e+00 : f32
    %2 = vector.broadcast %cst : f32 to vector<4x128xf32>
    %3 = arith.maximumf %0, %2 : vector<4x128xf32>
    %4 = math.absf %0 : vector<4x128xf32>
    %cst_3 = arith.constant 0.000000e+00 : f32
    %5 = vector.broadcast %cst_3 : f32 to vector<4x128xf32>
    %6 = arith.subf %5, %4 : vector<4x128xf32>
    %7 = math.exp %6 : vector<4x128xf32>
    %8 = math.log1p %7 : vector<4x128xf32>
    %9 = arith.addf %3, %8 : vector<4x128xf32>
    %cst_4 = arith.constant 1.000000e-03 : f32
    %10 = vector.broadcast %cst_4 : f32 to vector<4x128xf32>
    %11 = arith.addf %9, %10 : vector<4x128xf32>
    %12 = math.log %11 : vector<4x128xf32>
    %13 = vector.broadcast %1 : vector<1x128xf32> to vector<4x128xf32>
    %14 = arith.mulf %13, %12 : vector<4x128xf32>
    %15 = math.exp %14 : vector<4x128xf32>
    %c0_5 = arith.constant 0 : index
    %c0_6 = arith.constant 0 : index
    %16 = vector.load %arg4[%c0_5, %c0_6] : memref<4x128xf32, #tpu.memory_space<vmem>>, vector<4x128xf32>
    tpu.vector_store %arg4[%c0_5, %c0_6], %15 {strides = array<i32>} : memref<4x128xf32, #tpu.memory_space<vmem>>, vector<4x128xf32>,
    return
  }
  func.func @transform_0(%arg0: i32, %arg1: i32) -> (i32, i32) {
    %c0_i32 = arith.constant 0 : i32
    return %arg0, %arg1 : i32, i32
  }
  func.func @transform_1(%arg0: i32, %arg1: i32) -> (i32, i32) {
    %c0_i32 = arith.constant 0 : i32
    %c0_i32_0 = arith.constant 0 : i32
    return %c0_i32, %arg1 : i32, i32
  }
  func.func @transform_2(%arg0: i32, %arg1: i32) -> (i32, i32) {
    %c0_i32 = arith.constant 0 : i32
    return %arg0, %arg1 : i32, i32
  }
}

</mosaic_0001>

<bundles_post_ra>
// kernel: tpu_custom_call.1
= control target key start
LH: loop header
LB: loop body
LE: loop exit
PB: predicated region body
PF: predicated region fallthrough
CT: control target
= control target key end

     0   :  { %7 = vsyncpa [#allocation3], 0  ;;  %s202_s0 = inlined_call_operand.hbm [shape: f32[4,128], index: 0, kind: input, shape index: {}]   ;;  %s203_s1 = inlined_call_operand.hbm [shape: f32[1,128], index: 1, kind: input, shape index: {}]   ;;  %s204_s2 = inlined_call_operand.hbm [shape: f32[4,128], index: 2, kind: output, shape index: {}]  }
   0x1   :  { %8 = vsyncpa [#allocation6], 0 }
   0x2   :  { %9 = vsyncpa [#allocation4], 0  ;;  %s15_s11 = sshll.u32 %s202_s0, 4  ;;  %s175_s12 = smov [#allocation2]   ;;  %s16_s11 = int_to_ptr.hbm [resolvable:$true] %s15_s11 }
   0x3   :  { %s17_s13 = sshll.u32 %s175_s12, 4  ;;  %s26_s16 = sshll.u32 %s203_s1, 4  ;;  %s18_s13 = int_to_ptr.vmem [resolvable:$true] %s17_s13  ;;  %s27_s16 = int_to_ptr.hbm [resolvable:$true] %s26_s16 }
   0x4   :  { %20 = dma.hbm_to_vmem [thread:$0]  %s16_s11, 64, %s18_s13, [#allocation3]  }
   0x5   :  { %s176_s17 = smov [#allocation5]  }
   0x6   :  { %s28_s18 = sshll.u32 %s176_s17, 4  ;;  %s29_s18 = int_to_ptr.vmem [resolvable:$true] %s28_s18 }
   0x7   :  { %31 = dma.hbm_to_vmem [thread:$0]  %s27_s16, 16, %s29_s18, [#allocation6]  }
   0x8   :  { %169 = dma.done.wait [#allocation3], 64  }
   0x9   :  { %170 = vsyncadd [#allocation3], 4294967232 }
   0xa   :  { %171 = dma.done.wait [#allocation6], 16  }
   0xb   :  { %172 = vsyncadd [#allocation6], 4294967280  ;;  %v40_v0 = vld [vmem:[#allocation2] sm:$0xf]  ;;  %v88_v16 = vld [vmem:[#allocation5] ss:$0 sm:$0xff] }
   0xc   :  { %v43_v1 = vand.u32 2147483647, %v40_v0  ;;  %v42_v11 = vmax.f32 %v40_v0, 0.0  ;;  %s177_s0 = smov [#allocation7]   ;;  %s74_s21 = sshll.u32 %s204_s2, 4  ;;  %s75_s21 = int_to_ptr.hbm [resolvable:$true] %s74_s21 }
   0xd   :  { %s72_s1 = sshll.u32 %s177_s0, 4  ;;  %s73_s1 = int_to_ptr.vmem [resolvable:$true] %s72_s1 }
   0xe   :  { %v44_v2 = vsub.f32 0.0, %v43_v1 }
  0x10   :  { %v45_v3 = vmul.f32 1.442695, %v44_v2 }
  0x12   :  { %89 = vpow2.f32 %v45_v3 }
  0x18   :  { %v90_v4 = vpop.eup %89 }
  0x19   :  { %v47_v5 = vadd.f32 1.0, %v90_v4  ;;  %v50_v6 = vmul.f32 -0.5, %v90_v4  ;;  %v53_v8 = vand.u32 2147483647, %v90_v4 }
  0x1b   :  { %91 = vlog2.f32 %v47_v5  ;;  %v51_v7 = vadd.f32 1.0, %v50_v6  ;;  %vm54_vm0 = vcmp.lt.f32.partialorder %v53_v8, 0.0004427343 }
  0x1d   :  { %v52_v9 = vmul.f32 %v90_v4, %v51_v7 }
  0x21   :  { %v92_v10 = vpop.eup %91 }
  0x22   :  { %v49_v12 = vmul.f32 0.6931472, %v92_v10 }
  0x24   :  { %v55_v13 = vsel %vm54_vm0, %v52_v9, %v49_v12 }
  0x25   :  { %v56_v14 = vadd.f32 %v55_v13, %v42_v11 }
  0x27   :  { %v57_v15 = vadd.f32 0.001, %v56_v14 }
  0x29   :  { %93 = vlog2.f32 %v57_v15 }
  0x2f   :  { %v94_v17 = vpop.eup %93 }
  0x30   :  { %v59_v18 = vmul.f32 0.6931472, %v94_v17 }
  0x32   :  { %v63_v19 = vmul.f32 %v88_v16, %v59_v18 }
  0x34   :  { %v64_v20 = vmul.f32 1.442695, %v63_v19 }
  0x36   :  { %95 = vpow2.f32 %v64_v20 }
  0x3c   :  { %v96_v21 = vpop.eup %95 }
  0x3d   :  { %66 = vst [vmem:[#allocation7] sm:$0xf] %v96_v21 }
  0x3e   :  { %77 = dma.vmem_to_hbm [thread:$0]  %s73_s1, 64, %s75_s21, [#allocation4]  }
  0x3f   :  { %173 = dma.done.wait [#allocation4], 64  }
  0x40   :  { %174 = vsyncadd [#allocation4], 4294967232 }
  0x41   :  { %82 = vsyncpa [#allocation3], 1 }
  0x42   :  { %83 = vsyncpa [#allocation6], 1 }
  0x43   :  { %84 = vsyncpa [#allocation4], 1 }

</bundles_post_ra>
